<compile_context>
chip_gen: v5e
topology: v5e:2x2
jax: 0.10.0
libtpu: 0.0.40
codegen_flags: <defaults>
</compile_context>

<pallas_src>
import functools

import jax
import jax.numpy as jnp
from jax.experimental import pallas as pl
from jax.experimental.pallas import tpu as pltpu

ALPHA = 0.2          # LeakyReLU negative slope
NEG_BIG = -1e9       # additive mask value for padded nodes / non-edges


def _round_up(v, m):
    return (v + m - 1) // m * m


# ---------------------------------------------------------------------------
# Kernel A: feature transform + attention projections.
# ---------------------------------------------------------------------------
def _transform_kernel(x_ref, w_ref, at_ref, h_ref, fsrc_ref, fdst_ref):
    # h = x @ W  (bf16 inputs, f32 accumulation on the MXU)
    h = jnp.dot(x_ref[...], w_ref[...], preferred_element_type=jnp.float32)
    h_ref[...] = h.astype(jnp.bfloat16)

    # f_src[i] = h[i] . a[:F],  f_dst[i] = h[i] . a[F:]
    # VPU broadcast-multiply + lane reduce, f32 precision, no MXU pass.
    a_src = at_ref[0:1, :]                                   # (1, Fp)
    a_dst = at_ref[1:2, :]                                   # (1, Fp)
    fsrc_ref[...] = jnp.sum(h * a_src, axis=1, keepdims=True)
    fdst_ref[...] = jnp.sum(h * a_dst, axis=1, keepdims=True)


# ---------------------------------------------------------------------------
# Kernel B: attention logits + online softmax + aggregation (+ fused act.)
# ---------------------------------------------------------------------------
def _attend_kernel(fsrc_ref, fdst_ref, hk_ref, adj_ref, out_ref,
                   m_sc, l_sc, acc_sc, *, alpha, activation, n_valid):
    kj = pl.program_id(1)

    @pl.when(kj == 0)
    def _():
        m_sc[...] = jnp.full_like(m_sc, -jnp.inf)
        l_sc[...] = jnp.zeros_like(l_sc)
        acc_sc[...] = jnp.zeros_like(acc_sc)

    f1 = fsrc_ref[...]                        # (tq, 1)  f32
    f2 = fdst_ref[...]                        # (1, tk)  f32
    e = f1 + f2                               # broadcast add on the VPU
    e = jnp.where(e > 0, e, alpha * e)        # LeakyReLU
    logits = e + adj_ref[...].astype(jnp.float32)

    m_new = jnp.maximum(m_sc[...], jnp.max(logits, axis=1, keepdims=True))
    corr = jnp.exp(m_sc[...] - m_new)
    p = jnp.exp(logits - m_new)
    l_sc[...] = corr * l_sc[...] + jnp.sum(p, axis=1, keepdims=True)
    acc_sc[...] = corr * acc_sc[...] + jnp.dot(
        p.astype(jnp.bfloat16), hk_ref[...], preferred_element_type=jnp.float32)
    m_sc[...] = m_new

    @pl.when(kj == pl.num_programs(1) - 1)
    def _():
        h_prime = acc_sc[...] * pl.reciprocal(l_sc[...], approx=True)
        # (dropout == identity in eval mode)
        if activation == "elu":
            h_prime = jnp.where(h_prime > 0, h_prime,
                                jnp.exp(jnp.minimum(h_prime, 0.0)) - 1.0)
        elif activation == "softmax":
            # row softmax over the n_valid real columns (rest is lane padding)
            col = jax.lax.broadcasted_iota(jnp.int32, h_prime.shape, 1)
            z = jnp.where(col < n_valid, h_prime, NEG_BIG)
            z = z - jnp.max(z, axis=1, keepdims=True)
            pz = jnp.exp(z)
            h_prime = pz * pl.reciprocal(
                jnp.sum(pz, axis=1, keepdims=True), approx=True)
        out_ref[...] = h_prime.astype(out_ref.dtype)


# ---------------------------------------------------------------------------
# Single GAT layer wrapper.
# ---------------------------------------------------------------------------
def gat_layer_forward(x, W, a, adj, *, activation="none", block=128):
    """x:(N,Fin), W:(Fin,Fout), a:(2*Fout,1), adj:(N,N) additive bias."""
    N, Fin = x.shape
    Fout = W.shape[1]
    assert a.shape == (2 * Fout, 1)
    assert adj.shape == (N, N)

    # --- tiling / padding --------------------------------------------------
    blk = min(block, _round_up(N, 8))     # query/key tile rows (multiple of 8)
    Np = _round_up(N, blk)                # padded node count
    Fp = _round_up(Fout, 128)             # lane-dense feature width

    x_p = jnp.pad(x.astype(jnp.float32), ((0, Np - N), (0, 0)))
    adj_p = jnp.pad(adj.astype(jnp.float32), ((0, Np - N), (0, Np - N)),
                    constant_values=NEG_BIG)          # padded keys get no mass
    W_p = jnp.pad(W.astype(jnp.float32), ((0, 0), (0, Fp - Fout)))
    aT = jnp.pad(a.astype(jnp.float32).reshape(2, Fout),
                 ((0, 0), (0, Fp - Fout)))            # row0 = a_src, row1 = a_dst

    # bf16 for MXU inputs and adj DMA (2x less HBM traffic); softmax math
    # stays f32 inside the kernels.  (adj is a 0 / -1e9 mask-style bias, so
    # bf16 rounding of it is semantically harmless.)
    x_bf = x_p.astype(jnp.bfloat16)
    W_bf = W_p.astype(jnp.bfloat16)
    adj_bf = adj_p.astype(jnp.bfloat16)

    n_row = Np // blk
    vmem_limit = 32 * 1024 * 1024   # explicit: safe on v5e/v6e/v7x for these tiles

    # --- kernel A: h = x @ W, attention projections ------------------------
    h_bf, f_src, f_dst = pl.pallas_call(
        _transform_kernel,
        out_shape=(jax.ShapeDtypeStruct((Np, Fp), jnp.bfloat16),
                   jax.ShapeDtypeStruct((Np, 1), jnp.float32),
                   jax.ShapeDtypeStruct((Np, 1), jnp.float32)),
        grid=(n_row,),
        in_specs=[
            pl.BlockSpec((blk, Fin), lambda i: (i, 0)),
            pl.BlockSpec((Fin, Fp), lambda i: (0, 0)),
            pl.BlockSpec((2, Fp), lambda i: (0, 0)),
        ],
        out_specs=(
            pl.BlockSpec((blk, Fp), lambda i: (i, 0)),
            pl.BlockSpec((blk, 1), lambda i: (i, 0)),
            pl.BlockSpec((blk, 1), lambda i: (i, 0)),
        ),
        compiler_params=pltpu.CompilerParams(
            dimension_semantics=("parallel",),
            vmem_limit_bytes=vmem_limit),
    )(x_bf, W_bf, aT)

    # Per-key projection in (1, N) row layout so kernel B's
    # e[i,j] = f1[i] + f2[j] is a pure VPU broadcast add (no in-kernel transpose).
    f_dst_row = f_dst.reshape(1, Np)

    # --- kernel B: flash-style attention + aggregation ---------------------
    kernel = functools.partial(_attend_kernel, alpha=ALPHA,
                               activation=activation, n_valid=Fout)
    out = pl.pallas_call(
        kernel,
        out_shape=jax.ShapeDtypeStruct((Np, Fp), jnp.float32),
        grid=(n_row, n_row),                       # (query tiles, key tiles)
        in_specs=[
            pl.BlockSpec((blk, 1), lambda qi, kj: (qi, 0)),    # f_src (query)
            pl.BlockSpec((1, blk), lambda qi, kj: (0, kj)),    # f_dst (key row)
            pl.BlockSpec((blk, Fp), lambda qi, kj: (kj, 0)),   # h (key tile)
            pl.BlockSpec((blk, blk), lambda qi, kj: (qi, kj)),  # adj tile
        ],
        out_specs=pl.BlockSpec((blk, Fp), lambda qi, kj: (qi, 0)),
        scratch_shapes=[
            pltpu.VMEM((blk, 1), jnp.float32),     # running max
            pltpu.VMEM((blk, 1), jnp.float32),     # running denom
            pltpu.VMEM((blk, Fp), jnp.float32),    # output accumulator
        ],
        compiler_params=pltpu.CompilerParams(
            dimension_semantics=("parallel", "arbitrary"),
            vmem_limit_bytes=vmem_limit),
    )(f_src, f_dst_row, h_bf, adj_bf)

    return out[:N, :Fout]


@jax.jit
def gat_forward(x, adj, W1, a1, W2, a2):
    h = gat_layer_forward(x, W1, a1, adj, activation="elu")       # layer1 + ELU
    return gat_layer_forward(h, W2, a2, adj, activation="softmax")  # layer2 + softmax


# ---------------------------------------------------------------------------
# References (pure JAX).
# ---------------------------------------------------------------------------
def _layer_ref(x, W, a, adj, *, matched=False):
    F = W.shape[1]
    if matched:  # emulate the kernel's bf16-input / f32-accum precision choices
        x = x.astype(jnp.bfloat16).astype(jnp.float32)
        W = W.astype(jnp.bfloat16).astype(jnp.float32)
        adj = adj.astype(jnp.bfloat16).astype(jnp.float32)
    h = x @ W
    f1 = h @ a[:F, 0]
    f2 = h @ a[F:, 0]
    e = f1[:, None] + f2[None, :]
    e = jnp.where(e > 0, e, ALPHA * e)
    logits = e + adj
    m = jnp.max(logits, axis=1, keepdims=True)
    p = jnp.exp(logits - m)
    l = jnp.sum(p, axis=1, keepdims=True)
    if matched:
        num = (p.astype(jnp.bfloat16).astype(jnp.float32)
               @ h.astype(jnp.bfloat16).astype(jnp.float32))
    else:
        num = p @ h
    return num / l


def _gat_ref(x, adj, W1, a1, W2, a2, *, matched=False):
    h = _layer_ref(x, W1, a1, adj, matched=matched)
    h = jnp.where(h > 0, h, jnp.exp(jnp.minimum(h, 0.0)) - 1.0)   # ELU
    h = _layer_ref(h, W2, a2, adj, matched=matched)
    return jax.nn.softmax(h, axis=1)


def _xavier_uniform(key, shape, gain):
    fan_in, fan_out = shape[0], shape[1]
    bound = gain * jnp.sqrt(6.0 / (fan_in + fan_out))
    return jax.random.uniform(key, shape, jnp.float32, minval=-bound, maxval=bound)


if __name__ == "__main__":
    N, nfeat, nhid, nclass = 8, 16, 32, 7

    key = jax.random.PRNGKey(0)
    k_w1, k_a1, k_w2, k_a2, k_x, k_adj = jax.random.split(key, 6)

    W1 = _xavier_uniform(k_w1, (nfeat, nhid), gain=1.414)
    a1 = _xavier_uniform(k_a1, (2 * nhid, 1), gain=1.414)
    W2 = _xavier_uniform(k_w2, (nhid, nclass), gain=1.414)
    a2 = _xavier_uniform(k_a2, (2 * nclass, 1), gain=1.414)

    x = jax.random.normal(k_x, (N, nfeat), jnp.float32)
    # Additive adjacency bias: 0 for edges (incl. self-loops), -1e9 otherwise.
    edge = jax.random.bernoulli(k_adj, 0.5, (N, N)) | jnp.eye(N, dtype=bool)
    adj = jnp.where(edge, 0.0, NEG_BIG).astype(jnp.float32)

    out = gat_forward(x, adj, W1, a1, W2, a2)
    out = jax.block_until_ready(out)
    assert out.shape == (N, nclass)

    # Tight check vs a reference that matches the kernel's precision choices,
    # loose sanity check vs the pure-f32 reference (bf16 MXU inputs by design).
    ref_matched = _gat_ref(x, adj, W1, a1, W2, a2, matched=True)
    ref_f32 = _gat_ref(x, adj, W1, a1, W2, a2, matched=False)
    assert jnp.allclose(out, ref_matched, atol=1e-2, rtol=1e-2), \
        "mismatch vs matched-precision reference"
    assert jnp.allclose(out, ref_f32, atol=1e-1, rtol=1e-1), \
        "mismatch vs f32 reference"

    print("KERNEL_OK")
</pallas_src>

<mosaic_0001>
module attributes {stable_mosaic.version = 11 : i64} {
  func.func @_transform_kernel(%arg0: i32, %arg1: memref<8x16xbf16, #tpu.memory_space<vmem>>, %arg2: memref<16x128xbf16, #tpu.memory_space<vmem>>, %arg3: memref<2x128xf32, #tpu.memory_space<vmem>>, %arg4: memref<8x128xbf16, #tpu.memory_space<vmem>>, %arg5: memref<8x1xf32, #tpu.memory_space<vmem>>, %arg6: memref<8x1xf32, #tpu.memory_space<vmem>>) attributes {dimension_semantics = [#tpu.dimension_semantics<parallel>], iteration_bounds = array<i64: 1>, scalar_prefetch = 0 : i64, scratch_operands = 0 : i64, tpu.core_type = #tpu.core_type<tc>, window_params = [{transform_indices = @transform_0, window_bounds = array<i64: 8, 16>}, {pipeline_mode = #tpu.pipeline_mode<synchronous>, transform_indices = @transform_1, window_bounds = array<i64: 16, 128>}, {pipeline_mode = #tpu.pipeline_mode<synchronous>, transform_indices = @transform_2, window_bounds = array<i64: 2, 128>}, {transform_indices = @transform_3, window_bounds = array<i64: 8, 128>}, {transform_indices = @transform_4, window_bounds = array<i64: 8, 1>}, {transform_indices = @transform_5, window_bounds = array<i64: 8, 1>}]} {
    %c0 = arith.constant 0 : index
    %c0_0 = arith.constant 0 : index
    %0 = vector.load %arg1[%c0, %c0_0] : memref<8x16xbf16, #tpu.memory_space<vmem>>, vector<8x16xbf16>
    %c0_1 = arith.constant 0 : index
    %c0_2 = arith.constant 0 : index
    %1 = vector.load %arg2[%c0_1, %c0_2] : memref<16x128xbf16, #tpu.memory_space<vmem>>, vector<16x128xbf16>
    %cst = arith.constant dense<0.000000e+00> : vector<8x128xf32>
    %2 = tpu.matmul %0, %1, %cst {dimension_numbers = #tpu.dot_dimension_numbers<[1], [0], [0], [1], [0, 0, 1, 1], [], []>} : vector<8x16xbf16>, vector<16x128xbf16>, vector<8x128xf32> -> vector<8x128xf32>
    %3 = arith.truncf %2 : vector<8x128xf32> to vector<8x128xbf16>
    %c0_3 = arith.constant 0 : index
    %c0_4 = arith.constant 0 : index
    %4 = vector.load %arg4[%c0_3, %c0_4] : memref<8x128xbf16, #tpu.memory_space<vmem>>, vector<8x128xbf16>
    tpu.vector_store %arg4[%c0_3, %c0_4], %3 {strides = array<i32>} : memref<8x128xbf16, #tpu.memory_space<vmem>>, vector<8x128xbf16>,
    %c0_5 = arith.constant 0 : index
    %c0_6 = arith.constant 0 : index
    %5 = vector.load %arg3[%c0_5, %c0_6] : memref<2x128xf32, #tpu.memory_space<vmem>>, vector<1x128xf32>
    %c1 = arith.constant 1 : index
    %c0_7 = arith.constant 0 : index
    %6 = vector.load %arg3[%c1, %c0_7] : memref<2x128xf32, #tpu.memory_space<vmem>>, vector<1x128xf32>
    %7 = vector.broadcast %5 : vector<1x128xf32> to vector<8x128xf32>
    %8 = arith.mulf %2, %7 : vector<8x128xf32>
    %cst_8 = arith.constant dense<0.000000e+00> : vector<8xf32>
    %9 = vector.multi_reduction <add>, %8, %cst_8 [1] : vector<8x128xf32> to vector<8xf32>
    %10 = vector.shape_cast %9 : vector<8xf32> to vector<8x1xf32>
    %c0_9 = arith.constant 0 : index
    %c0_10 = arith.constant 0 : index
    %11 = vector.load %arg5[%c0_9, %c0_10] : memref<8x1xf32, #tpu.memory_space<vmem>>, vector<8x1xf32>
    tpu.vector_store %arg5[%c0_9, %c0_10], %10 {strides = array<i32>} : memref<8x1xf32, #tpu.memory_space<vmem>>, vector<8x1xf32>,
    %12 = vector.broadcast %6 : vector<1x128xf32> to vector<8x128xf32>
    %13 = arith.mulf %2, %12 : vector<8x128xf32>
    %cst_11 = arith.constant dense<0.000000e+00> : vector<8xf32>
    %14 = vector.multi_reduction <add>, %13, %cst_11 [1] : vector<8x128xf32> to vector<8xf32>
    %15 = vector.shape_cast %14 : vector<8xf32> to vector<8x1xf32>
    %c0_12 = arith.constant 0 : index
    %c0_13 = arith.constant 0 : index
    %16 = vector.load %arg6[%c0_12, %c0_13] : memref<8x1xf32, #tpu.memory_space<vmem>>, vector<8x1xf32>
    tpu.vector_store %arg6[%c0_12, %c0_13], %15 {strides = array<i32>} : memref<8x1xf32, #tpu.memory_space<vmem>>, vector<8x1xf32>,
    return
  }
  func.func @transform_0(%arg0: i32) -> (i32, i32) {
    %c0_i32 = arith.constant 0 : i32
    %c0_i32_0 = arith.constant 0 : i32
    return %arg0, %c0_i32 : i32, i32
  }
  func.func @transform_1(%arg0: i32) -> (i32, i32) {
    %c0_i32 = arith.constant 0 : i32
    %c0_i32_0 = arith.constant 0 : i32
    %c0_i32_1 = arith.constant 0 : i32
    return %c0_i32, %c0_i32_0 : i32, i32
  }
  func.func @transform_2(%arg0: i32) -> (i32, i32) {
    %c0_i32 = arith.constant 0 : i32
    %c0_i32_0 = arith.constant 0 : i32
    %c0_i32_1 = arith.constant 0 : i32
    return %c0_i32, %c0_i32_0 : i32, i32
  }
  func.func @transform_3(%arg0: i32) -> (i32, i32) {
    %c0_i32 = arith.constant 0 : i32
    %c0_i32_0 = arith.constant 0 : i32
    return %arg0, %c0_i32 : i32, i32
  }
  func.func @transform_4(%arg0: i32) -> (i32, i32) {
    %c0_i32 = arith.constant 0 : i32
    %c0_i32_0 = arith.constant 0 : i32
    return %arg0, %c0_i32 : i32, i32
  }
  func.func @transform_5(%arg0: i32) -> (i32, i32) {
    %c0_i32 = arith.constant 0 : i32
    %c0_i32_0 = arith.constant 0 : i32
    return %arg0, %c0_i32 : i32, i32
  }
}

module attributes {stable_mosaic.version = 11 : i64} {
  func.func @_attend_kernel(%arg0: i32, %arg1: i32, %arg2: memref<8x1xf32, #tpu.memory_space<vmem>>, %arg3: memref<1x8xf32, #tpu.memory_space<vmem>>, %arg4: memref<8x128xbf16, #tpu.memory_space<vmem>>, %arg5: memref<8x8xbf16, #tpu.memory_space<vmem>>, %arg6: memref<8x128xf32, #tpu.memory_space<vmem>>, %arg7: memref<8x1xf32, #tpu.memory_space<vmem>>, %arg8: memref<8x1xf32, #tpu.memory_space<vmem>>, %arg9: memref<8x128xf32, #tpu.memory_space<vmem>>) attributes {dimension_semantics = [#tpu.dimension_semantics<parallel>, #tpu.dimension_semantics<arbitrary>], iteration_bounds = array<i64: 1, 1>, scalar_prefetch = 0 : i64, scratch_operands = 3 : i64, tpu.core_type = #tpu.core_type<tc>, window_params = [{transform_indices = @transform_0, window_bounds = array<i64: 8, 1>}, {transform_indices = @transform_1, window_bounds = array<i64: 1, 8>}, {transform_indices = @transform_2, window_bounds = array<i64: 8, 128>}, {transform_indices = @transform_3, window_bounds = array<i64: 8, 8>}, {transform_indices = @transform_4, window_bounds = array<i64: 8, 128>}]} {
    %c0_i32 = arith.constant 0 : i32
    %0 = arith.cmpi eq, %arg1, %c0_i32 : i32
    %1 = arith.extui %0 : i1 to i32
    %c0_i32_0 = arith.constant 0 : i32
    %2 = arith.cmpi ne, %1, %c0_i32_0 : i32
    scf.if %2 {
      %cst_28 = arith.constant 0xFF800000 : f32
      %44 = vector.broadcast %cst_28 : f32 to vector<8x1xf32>
      %c0_29 = arith.constant 0 : index
      %c0_30 = arith.constant 0 : index
      %45 = vector.load %arg7[%c0_29, %c0_30] : memref<8x1xf32, #tpu.memory_space<vmem>>, vector<8x1xf32>
      tpu.vector_store %arg7[%c0_29, %c0_30], %44 {strides = array<i32>} : memref<8x1xf32, #tpu.memory_space<vmem>>, vector<8x1xf32>,
      %cst_31 = arith.constant 0.000000e+00 : f32
      %46 = vector.broadcast %cst_31 : f32 to vector<8x1xf32>
      %c0_32 = arith.constant 0 : index
      %c0_33 = arith.constant 0 : index
      %47 = vector.load %arg8[%c0_32, %c0_33] : memref<8x1xf32, #tpu.memory_space<vmem>>, vector<8x1xf32>
      tpu.vector_store %arg8[%c0_32, %c0_33], %46 {strides = array<i32>} : memref<8x1xf32, #tpu.memory_space<vmem>>, vector<8x1xf32>,
      %cst_34 = arith.constant 0.000000e+00 : f32
      %48 = vector.broadcast %cst_34 : f32 to vector<8x128xf32>
      %c0_35 = arith.constant 0 : index
      %c0_36 = arith.constant 0 : index
      %49 = vector.load %arg9[%c0_35, %c0_36] : memref<8x128xf32, #tpu.memory_space<vmem>>, vector<8x128xf32>
      tpu.vector_store %arg9[%c0_35, %c0_36], %48 {strides = array<i32>} : memref<8x128xf32, #tpu.memory_space<vmem>>, vector<8x128xf32>,
    } else {
    }
    %c0 = arith.constant 0 : index
    %c0_1 = arith.constant 0 : index
    %3 = vector.load %arg2[%c0, %c0_1] : memref<8x1xf32, #tpu.memory_space<vmem>>, vector<8x1xf32>
    %c0_2 = arith.constant 0 : index
    %c0_3 = arith.constant 0 : index
    %4 = vector.load %arg3[%c0_2, %c0_3] : memref<1x8xf32, #tpu.memory_space<vmem>>, vector<1x8xf32>
    %5 = vector.broadcast %3 : vector<8x1xf32> to vector<8x8xf32>
    %6 = vector.broadcast %4 : vector<1x8xf32> to vector<8x8xf32>
    %7 = arith.addf %5, %6 : vector<8x8xf32>
    %cst = arith.constant 0.000000e+00 : f32
    %8 = vector.broadcast %cst : f32 to vector<8x8xf32>
    %9 = arith.cmpf ogt, %7, %8 : vector<8x8xf32>
    %cst_4 = arith.constant 2.000000e-01 : f32
    %10 = vector.broadcast %cst_4 : f32 to vector<8x8xf32>
    %11 = arith.mulf %10, %7 : vector<8x8xf32>
    %12 = arith.select %9, %7, %11 : vector<8x8xi1>, vector<8x8xf32>
    %c0_5 = arith.constant 0 : index
    %c0_6 = arith.constant 0 : index
    %13 = vector.load %arg5[%c0_5, %c0_6] : memref<8x8xbf16, #tpu.memory_space<vmem>>, vector<8x8xbf16>
    %14 = arith.extf %13 : vector<8x8xbf16> to vector<8x8xf32>
    %15 = arith.addf %12, %14 : vector<8x8xf32>
    %c0_7 = arith.constant 0 : index
    %c0_8 = arith.constant 0 : index
    %16 = vector.load %arg7[%c0_7, %c0_8] : memref<8x1xf32, #tpu.memory_space<vmem>>, vector<8x1xf32>
    %cst_9 = arith.constant dense<0xFF800000> : vector<8xf32>
    %17 = vector.multi_reduction <maximumf>, %15, %cst_9 [1] : vector<8x8xf32> to vector<8xf32>
    %18 = vector.shape_cast %17 : vector<8xf32> to vector<8x1xf32>
    %19 = arith.maximumf %16, %18 : vector<8x1xf32>
    %c0_10 = arith.constant 0 : index
    %c0_11 = arith.constant 0 : index
    %20 = vector.load %arg7[%c0_10, %c0_11] : memref<8x1xf32, #tpu.memory_space<vmem>>, vector<8x1xf32>
    %21 = arith.subf %20, %19 : vector<8x1xf32>
    %22 = math.exp %21 : vector<8x1xf32>
    %23 = vector.broadcast %19 : vector<8x1xf32> to vector<8x8xf32>
    %24 = arith.subf %15, %23 : vector<8x8xf32>
    %25 = math.exp %24 : vector<8x8xf32>
    %c0_12 = arith.constant 0 : index
    %c0_13 = arith.constant 0 : index
    %26 = vector.load %arg8[%c0_12, %c0_13] : memref<8x1xf32, #tpu.memory_space<vmem>>, vector<8x1xf32>
    %27 = arith.mulf %22, %26 : vector<8x1xf32>
    %cst_14 = arith.constant dense<0.000000e+00> : vector<8xf32>
    %28 = vector.multi_reduction <add>, %25, %cst_14 [1] : vector<8x8xf32> to vector<8xf32>
    %29 = vector.shape_cast %28 : vector<8xf32> to vector<8x1xf32>
    %30 = arith.addf %27, %29 : vector<8x1xf32>
    %c0_15 = arith.constant 0 : index
    %c0_16 = arith.constant 0 : index
    %31 = vector.load %arg8[%c0_15, %c0_16] : memref<8x1xf32, #tpu.memory_space<vmem>>, vector<8x1xf32>
    tpu.vector_store %arg8[%c0_15, %c0_16], %30 {strides = array<i32>} : memref<8x1xf32, #tpu.memory_space<vmem>>, vector<8x1xf32>,
    %c0_17 = arith.constant 0 : index
    %c0_18 = arith.constant 0 : index
    %32 = vector.load %arg9[%c0_17, %c0_18] : memref<8x128xf32, #tpu.memory_space<vmem>>, vector<8x128xf32>
    %33 = vector.broadcast %22 : vector<8x1xf32> to vector<8x128xf32>
    %34 = arith.mulf %33, %32 : vector<8x128xf32>
    %35 = arith.truncf %25 : vector<8x8xf32> to vector<8x8xbf16>
    %c0_19 = arith.constant 0 : index
    %c0_20 = arith.constant 0 : index
    %36 = vector.load %arg4[%c0_19, %c0_20] : memref<8x128xbf16, #tpu.memory_space<vmem>>, vector<8x128xbf16>
    %cst_21 = arith.constant dense<0.000000e+00> : vector<8x128xf32>
    %37 = tpu.matmul %35, %36, %cst_21 {dimension_numbers = #tpu.dot_dimension_numbers<[1], [0], [0], [1], [0, 0, 1, 1], [], []>} : vector<8x8xbf16>, vector<8x128xbf16>, vector<8x128xf32> -> vector<8x128xf32>
    %38 = arith.addf %34, %37 : vector<8x128xf32>
    %c0_22 = arith.constant 0 : index
    %c0_23 = arith.constant 0 : index
    %39 = vector.load %arg9[%c0_22, %c0_23] : memref<8x128xf32, #tpu.memory_space<vmem>>, vector<8x128xf32>
    tpu.vector_store %arg9[%c0_22, %c0_23], %38 {strides = array<i32>} : memref<8x128xf32, #tpu.memory_space<vmem>>, vector<8x128xf32>,
    %c0_24 = arith.constant 0 : index
    %c0_25 = arith.constant 0 : index
    %40 = vector.load %arg7[%c0_24, %c0_25] : memref<8x1xf32, #tpu.memory_space<vmem>>, vector<8x1xf32>
    tpu.vector_store %arg7[%c0_24, %c0_25], %19 {strides = array<i32>} : memref<8x1xf32, #tpu.memory_space<vmem>>, vector<8x1xf32>,
    %c0_i32_26 = arith.constant 0 : i32
    %41 = arith.cmpi eq, %arg1, %c0_i32_26 : i32
    %42 = arith.extui %41 : i1 to i32
    %c0_i32_27 = arith.constant 0 : i32
    %43 = arith.cmpi ne, %42, %c0_i32_27 : i32
    scf.if %43 {
      %c0_28 = arith.constant 0 : index
      %c0_29 = arith.constant 0 : index
      %44 = vector.load %arg9[%c0_28, %c0_29] : memref<8x128xf32, #tpu.memory_space<vmem>>, vector<8x128xf32>
      %c0_30 = arith.constant 0 : index
      %c0_31 = arith.constant 0 : index
      %45 = vector.load %arg8[%c0_30, %c0_31] : memref<8x1xf32, #tpu.memory_space<vmem>>, vector<8x1xf32>
      %46 = tpu.reciprocal %45 {approx = true} : vector<8x1xf32> -> vector<8x1xf32>
      %47 = vector.broadcast %46 : vector<8x1xf32> to vector<8x128xf32>
      %48 = arith.mulf %44, %47 : vector<8x128xf32>
      %cst_32 = arith.constant 0.000000e+00 : f32
      %49 = vector.broadcast %cst_32 : f32 to vector<8x128xf32>
      %50 = arith.cmpf ogt, %48, %49 : vector<8x128xf32>
      %cst_33 = arith.constant 0.000000e+00 : f32
      %51 = vector.broadcast %cst_33 : f32 to vector<8x128xf32>
      %52 = arith.minimumf %48, %51 : vector<8x128xf32>
      %53 = math.exp %52 : vector<8x128xf32>
      %cst_34 = arith.constant 1.000000e+00 : f32
      %54 = vector.broadcast %cst_34 : f32 to vector<8x128xf32>
      %55 = arith.subf %53, %54 : vector<8x128xf32>
      %56 = arith.select %50, %48, %55 : vector<8x128xi1>, vector<8x128xf32>
      %c0_35 = arith.constant 0 : index
      %c0_36 = arith.constant 0 : index
      %57 = vector.load %arg6[%c0_35, %c0_36] : memref<8x128xf32, #tpu.memory_space<vmem>>, vector<8x128xf32>
      tpu.vector_store %arg6[%c0_35, %c0_36], %56 {strides = array<i32>} : memref<8x128xf32, #tpu.memory_space<vmem>>, vector<8x128xf32>,
    } else {
    }
    return
  }
  func.func @transform_0(%arg0: i32, %arg1: i32) -> (i32, i32) {
    %c0_i32 = arith.constant 0 : i32
    %c0_i32_0 = arith.constant 0 : i32
    return %arg0, %c0_i32 : i32, i32
  }
  func.func @transform_1(%arg0: i32, %arg1: i32) -> (i32, i32) {
    %c0_i32 = arith.constant 0 : i32
    %c0_i32_0 = arith.constant 0 : i32
    return %c0_i32, %arg1 : i32, i32
  }
  func.func @transform_2(%arg0: i32, %arg1: i32) -> (i32, i32) {
    %c0_i32 = arith.constant 0 : i32
    %c0_i32_0 = arith.constant 0 : i32
    return %arg1, %c0_i32 : i32, i32
  }
  func.func @transform_3(%arg0: i32, %arg1: i32) -> (i32, i32) {
    %c0_i32 = arith.constant 0 : i32
    return %arg0, %arg1 : i32, i32
  }
  func.func @transform_4(%arg0: i32, %arg1: i32) -> (i32, i32) {
    %c0_i32 = arith.constant 0 : i32
    %c0_i32_0 = arith.constant 0 : i32
    return %arg0, %c0_i32 : i32, i32
  }
}

module attributes {stable_mosaic.version = 11 : i64} {
  func.func @_transform_kernel(%arg0: i32, %arg1: memref<8x32xbf16, #tpu.memory_space<vmem>>, %arg2: memref<32x128xbf16, #tpu.memory_space<vmem>>, %arg3: memref<2x128xf32, #tpu.memory_space<vmem>>, %arg4: memref<8x128xbf16, #tpu.memory_space<vmem>>, %arg5: memref<8x1xf32, #tpu.memory_space<vmem>>, %arg6: memref<8x1xf32, #tpu.memory_space<vmem>>) attributes {dimension_semantics = [#tpu.dimension_semantics<parallel>], iteration_bounds = array<i64: 1>, scalar_prefetch = 0 : i64, scratch_operands = 0 : i64, tpu.core_type = #tpu.core_type<tc>, window_params = [{transform_indices = @transform_0, window_bounds = array<i64: 8, 32>}, {pipeline_mode = #tpu.pipeline_mode<synchronous>, transform_indices = @transform_1, window_bounds = array<i64: 32, 128>}, {pipeline_mode = #tpu.pipeline_mode<synchronous>, transform_indices = @transform_2, window_bounds = array<i64: 2, 128>}, {transform_indices = @transform_3, window_bounds = array<i64: 8, 128>}, {transform_indices = @transform_4, window_bounds = array<i64: 8, 1>}, {transform_indices = @transform_5, window_bounds = array<i64: 8, 1>}]} {
    %c0 = arith.constant 0 : index
    %c0_0 = arith.constant 0 : index
    %0 = vector.load %arg1[%c0, %c0_0] : memref<8x32xbf16, #tpu.memory_space<vmem>>, vector<8x32xbf16>
    %c0_1 = arith.constant 0 : index
    %c0_2 = arith.constant 0 : index
    %1 = vector.load %arg2[%c0_1, %c0_2] : memref<32x128xbf16, #tpu.memory_space<vmem>>, vector<32x128xbf16>
    %cst = arith.constant dense<0.000000e+00> : vector<8x128xf32>
    %2 = tpu.matmul %0, %1, %cst {dimension_numbers = #tpu.dot_dimension_numbers<[1], [0], [0], [1], [0, 0, 1, 1], [], []>} : vector<8x32xbf16>, vector<32x128xbf16>, vector<8x128xf32> -> vector<8x128xf32>
    %3 = arith.truncf %2 : vector<8x128xf32> to vector<8x128xbf16>
    %c0_3 = arith.constant 0 : index
    %c0_4 = arith.constant 0 : index
    %4 = vector.load %arg4[%c0_3, %c0_4] : memref<8x128xbf16, #tpu.memory_space<vmem>>, vector<8x128xbf16>
    tpu.vector_store %arg4[%c0_3, %c0_4], %3 {strides = array<i32>} : memref<8x128xbf16, #tpu.memory_space<vmem>>, vector<8x128xbf16>,
    %c0_5 = arith.constant 0 : index
    %c0_6 = arith.constant 0 : index
    %5 = vector.load %arg3[%c0_5, %c0_6] : memref<2x128xf32, #tpu.memory_space<vmem>>, vector<1x128xf32>
    %c1 = arith.constant 1 : index
    %c0_7 = arith.constant 0 : index
    %6 = vector.load %arg3[%c1, %c0_7] : memref<2x128xf32, #tpu.memory_space<vmem>>, vector<1x128xf32>
    %7 = vector.broadcast %5 : vector<1x128xf32> to vector<8x128xf32>
    %8 = arith.mulf %2, %7 : vector<8x128xf32>
    %cst_8 = arith.constant dense<0.000000e+00> : vector<8xf32>
    %9 = vector.multi_reduction <add>, %8, %cst_8 [1] : vector<8x128xf32> to vector<8xf32>
    %10 = vector.shape_cast %9 : vector<8xf32> to vector<8x1xf32>
    %c0_9 = arith.constant 0 : index
    %c0_10 = arith.constant 0 : index
    %11 = vector.load %arg5[%c0_9, %c0_10] : memref<8x1xf32, #tpu.memory_space<vmem>>, vector<8x1xf32>
    tpu.vector_store %arg5[%c0_9, %c0_10], %10 {strides = array<i32>} : memref<8x1xf32, #tpu.memory_space<vmem>>, vector<8x1xf32>,
    %12 = vector.broadcast %6 : vector<1x128xf32> to vector<8x128xf32>
    %13 = arith.mulf %2, %12 : vector<8x128xf32>
    %cst_11 = arith.constant dense<0.000000e+00> : vector<8xf32>
    %14 = vector.multi_reduction <add>, %13, %cst_11 [1] : vector<8x128xf32> to vector<8xf32>
    %15 = vector.shape_cast %14 : vector<8xf32> to vector<8x1xf32>
    %c0_12 = arith.constant 0 : index
    %c0_13 = arith.constant 0 : index
    %16 = vector.load %arg6[%c0_12, %c0_13] : memref<8x1xf32, #tpu.memory_space<vmem>>, vector<8x1xf32>
    tpu.vector_store %arg6[%c0_12, %c0_13], %15 {strides = array<i32>} : memref<8x1xf32, #tpu.memory_space<vmem>>, vector<8x1xf32>,
    return
  }
  func.func @transform_0(%arg0: i32) -> (i32, i32) {
    %c0_i32 = arith.constant 0 : i32
    %c0_i32_0 = arith.constant 0 : i32
    return %arg0, %c0_i32 : i32, i32
  }
  func.func @transform_1(%arg0: i32) -> (i32, i32) {
    %c0_i32 = arith.constant 0 : i32
    %c0_i32_0 = arith.constant 0 : i32
    %c0_i32_1 = arith.constant 0 : i32
    return %c0_i32, %c0_i32_0 : i32, i32
  }
  func.func @transform_2(%arg0: i32) -> (i32, i32) {
    %c0_i32 = arith.constant 0 : i32
    %c0_i32_0 = arith.constant 0 : i32
    %c0_i32_1 = arith.constant 0 : i32
    return %c0_i32, %c0_i32_0 : i32, i32
  }
  func.func @transform_3(%arg0: i32) -> (i32, i32) {
    %c0_i32 = arith.constant 0 : i32
    %c0_i32_0 = arith.constant 0 : i32
    return %arg0, %c0_i32 : i32, i32
  }
  func.func @transform_4(%arg0: i32) -> (i32, i32) {
    %c0_i32 = arith.constant 0 : i32
    %c0_i32_0 = arith.constant 0 : i32
    return %arg0, %c0_i32 : i32, i32
  }
  func.func @transform_5(%arg0: i32) -> (i32, i32) {
    %c0_i32 = arith.constant 0 : i32
    %c0_i32_0 = arith.constant 0 : i32
    return %arg0, %c0_i32 : i32, i32
  }
}

module attributes {stable_mosaic.version = 11 : i64} {
  func.func @_attend_kernel(%arg0: i32, %arg1: i32, %arg2: memref<8x1xf32, #tpu.memory_space<vmem>>, %arg3: memref<1x8xf32, #tpu.memory_space<vmem>>, %arg4: memref<8x128xbf16, #tpu.memory_space<vmem>>, %arg5: memref<8x8xbf16, #tpu.memory_space<vmem>>, %arg6: memref<8x128xf32, #tpu.memory_space<vmem>>, %arg7: memref<8x1xf32, #tpu.memory_space<vmem>>, %arg8: memref<8x1xf32, #tpu.memory_space<vmem>>, %arg9: memref<8x128xf32, #tpu.memory_space<vmem>>) attributes {dimension_semantics = [#tpu.dimension_semantics<parallel>, #tpu.dimension_semantics<arbitrary>], iteration_bounds = array<i64: 1, 1>, scalar_prefetch = 0 : i64, scratch_operands = 3 : i64, tpu.core_type = #tpu.core_type<tc>, window_params = [{transform_indices = @transform_0, window_bounds = array<i64: 8, 1>}, {transform_indices = @transform_1, window_bounds = array<i64: 1, 8>}, {transform_indices = @transform_2, window_bounds = array<i64: 8, 128>}, {transform_indices = @transform_3, window_bounds = array<i64: 8, 8>}, {transform_indices = @transform_4, window_bounds = array<i64: 8, 128>}]} {
    %c0_i32 = arith.constant 0 : i32
    %0 = arith.cmpi eq, %arg1, %c0_i32 : i32
    %1 = arith.extui %0 : i1 to i32
    %c0_i32_0 = arith.constant 0 : i32
    %2 = arith.cmpi ne, %1, %c0_i32_0 : i32
    scf.if %2 {
      %cst_28 = arith.constant 0xFF800000 : f32
      %44 = vector.broadcast %cst_28 : f32 to vector<8x1xf32>
      %c0_29 = arith.constant 0 : index
      %c0_30 = arith.constant 0 : index
      %45 = vector.load %arg7[%c0_29, %c0_30] : memref<8x1xf32, #tpu.memory_space<vmem>>, vector<8x1xf32>
      tpu.vector_store %arg7[%c0_29, %c0_30], %44 {strides = array<i32>} : memref<8x1xf32, #tpu.memory_space<vmem>>, vector<8x1xf32>,
      %cst_31 = arith.constant 0.000000e+00 : f32
      %46 = vector.broadcast %cst_31 : f32 to vector<8x1xf32>
      %c0_32 = arith.constant 0 : index
      %c0_33 = arith.constant 0 : index
      %47 = vector.load %arg8[%c0_32, %c0_33] : memref<8x1xf32, #tpu.memory_space<vmem>>, vector<8x1xf32>
      tpu.vector_store %arg8[%c0_32, %c0_33], %46 {strides = array<i32>} : memref<8x1xf32, #tpu.memory_space<vmem>>, vector<8x1xf32>,
      %cst_34 = arith.constant 0.000000e+00 : f32
      %48 = vector.broadcast %cst_34 : f32 to vector<8x128xf32>
      %c0_35 = arith.constant 0 : index
      %c0_36 = arith.constant 0 : index
      %49 = vector.load %arg9[%c0_35, %c0_36] : memref<8x128xf32, #tpu.memory_space<vmem>>, vector<8x128xf32>
      tpu.vector_store %arg9[%c0_35, %c0_36], %48 {strides = array<i32>} : memref<8x128xf32, #tpu.memory_space<vmem>>, vector<8x128xf32>,
    } else {
    }
    %c0 = arith.constant 0 : index
    %c0_1 = arith.constant 0 : index
    %3 = vector.load %arg2[%c0, %c0_1] : memref<8x1xf32, #tpu.memory_space<vmem>>, vector<8x1xf32>
    %c0_2 = arith.constant 0 : index
    %c0_3 = arith.constant 0 : index
    %4 = vector.load %arg3[%c0_2, %c0_3] : memref<1x8xf32, #tpu.memory_space<vmem>>, vector<1x8xf32>
    %5 = vector.broadcast %3 : vector<8x1xf32> to vector<8x8xf32>
    %6 = vector.broadcast %4 : vector<1x8xf32> to vector<8x8xf32>
    %7 = arith.addf %5, %6 : vector<8x8xf32>
    %cst = arith.constant 0.000000e+00 : f32
    %8 = vector.broadcast %cst : f32 to vector<8x8xf32>
    %9 = arith.cmpf ogt, %7, %8 : vector<8x8xf32>
    %cst_4 = arith.constant 2.000000e-01 : f32
    %10 = vector.broadcast %cst_4 : f32 to vector<8x8xf32>
    %11 = arith.mulf %10, %7 : vector<8x8xf32>
    %12 = arith.select %9, %7, %11 : vector<8x8xi1>, vector<8x8xf32>
    %c0_5 = arith.constant 0 : index
    %c0_6 = arith.constant 0 : index
    %13 = vector.load %arg5[%c0_5, %c0_6] : memref<8x8xbf16, #tpu.memory_space<vmem>>, vector<8x8xbf16>
    %14 = arith.extf %13 : vector<8x8xbf16> to vector<8x8xf32>
    %15 = arith.addf %12, %14 : vector<8x8xf32>
    %c0_7 = arith.constant 0 : index
    %c0_8 = arith.constant 0 : index
    %16 = vector.load %arg7[%c0_7, %c0_8] : memref<8x1xf32, #tpu.memory_space<vmem>>, vector<8x1xf32>
    %cst_9 = arith.constant dense<0xFF800000> : vector<8xf32>
    %17 = vector.multi_reduction <maximumf>, %15, %cst_9 [1] : vector<8x8xf32> to vector<8xf32>
    %18 = vector.shape_cast %17 : vector<8xf32> to vector<8x1xf32>
    %19 = arith.maximumf %16, %18 : vector<8x1xf32>
    %c0_10 = arith.constant 0 : index
    %c0_11 = arith.constant 0 : index
    %20 = vector.load %arg7[%c0_10, %c0_11] : memref<8x1xf32, #tpu.memory_space<vmem>>, vector<8x1xf32>
    %21 = arith.subf %20, %19 : vector<8x1xf32>
    %22 = math.exp %21 : vector<8x1xf32>
    %23 = vector.broadcast %19 : vector<8x1xf32> to vector<8x8xf32>
    %24 = arith.subf %15, %23 : vector<8x8xf32>
    %25 = math.exp %24 : vector<8x8xf32>
    %c0_12 = arith.constant 0 : index
    %c0_13 = arith.constant 0 : index
    %26 = vector.load %arg8[%c0_12, %c0_13] : memref<8x1xf32, #tpu.memory_space<vmem>>, vector<8x1xf32>
    %27 = arith.mulf %22, %26 : vector<8x1xf32>
    %cst_14 = arith.constant dense<0.000000e+00> : vector<8xf32>
    %28 = vector.multi_reduction <add>, %25, %cst_14 [1] : vector<8x8xf32> to vector<8xf32>
    %29 = vector.shape_cast %28 : vector<8xf32> to vector<8x1xf32>
    %30 = arith.addf %27, %29 : vector<8x1xf32>
    %c0_15 = arith.constant 0 : index
    %c0_16 = arith.constant 0 : index
    %31 = vector.load %arg8[%c0_15, %c0_16] : memref<8x1xf32, #tpu.memory_space<vmem>>, vector<8x1xf32>
    tpu.vector_store %arg8[%c0_15, %c0_16], %30 {strides = array<i32>} : memref<8x1xf32, #tpu.memory_space<vmem>>, vector<8x1xf32>,
    %c0_17 = arith.constant 0 : index
    %c0_18 = arith.constant 0 : index
    %32 = vector.load %arg9[%c0_17, %c0_18] : memref<8x128xf32, #tpu.memory_space<vmem>>, vector<8x128xf32>
    %33 = vector.broadcast %22 : vector<8x1xf32> to vector<8x128xf32>
    %34 = arith.mulf %33, %32 : vector<8x128xf32>
    %35 = arith.truncf %25 : vector<8x8xf32> to vector<8x8xbf16>
    %c0_19 = arith.constant 0 : index
    %c0_20 = arith.constant 0 : index
    %36 = vector.load %arg4[%c0_19, %c0_20] : memref<8x128xbf16, #tpu.memory_space<vmem>>, vector<8x128xbf16>
    %cst_21 = arith.constant dense<0.000000e+00> : vector<8x128xf32>
    %37 = tpu.matmul %35, %36, %cst_21 {dimension_numbers = #tpu.dot_dimension_numbers<[1], [0], [0], [1], [0, 0, 1, 1], [], []>} : vector<8x8xbf16>, vector<8x128xbf16>, vector<8x128xf32> -> vector<8x128xf32>
    %38 = arith.addf %34, %37 : vector<8x128xf32>
    %c0_22 = arith.constant 0 : index
    %c0_23 = arith.constant 0 : index
    %39 = vector.load %arg9[%c0_22, %c0_23] : memref<8x128xf32, #tpu.memory_space<vmem>>, vector<8x128xf32>
    tpu.vector_store %arg9[%c0_22, %c0_23], %38 {strides = array<i32>} : memref<8x128xf32, #tpu.memory_space<vmem>>, vector<8x128xf32>,
    %c0_24 = arith.constant 0 : index
    %c0_25 = arith.constant 0 : index
    %40 = vector.load %arg7[%c0_24, %c0_25] : memref<8x1xf32, #tpu.memory_space<vmem>>, vector<8x1xf32>
    tpu.vector_store %arg7[%c0_24, %c0_25], %19 {strides = array<i32>} : memref<8x1xf32, #tpu.memory_space<vmem>>, vector<8x1xf32>,
    %c0_i32_26 = arith.constant 0 : i32
    %41 = arith.cmpi eq, %arg1, %c0_i32_26 : i32
    %42 = arith.extui %41 : i1 to i32
    %c0_i32_27 = arith.constant 0 : i32
    %43 = arith.cmpi ne, %42, %c0_i32_27 : i32
    scf.if %43 {
      %c0_28 = arith.constant 0 : index
      %c0_29 = arith.constant 0 : index
      %44 = vector.load %arg9[%c0_28, %c0_29] : memref<8x128xf32, #tpu.memory_space<vmem>>, vector<8x128xf32>
      %c0_30 = arith.constant 0 : index
      %c0_31 = arith.constant 0 : index
      %45 = vector.load %arg8[%c0_30, %c0_31] : memref<8x1xf32, #tpu.memory_space<vmem>>, vector<8x1xf32>
      %46 = tpu.reciprocal %45 {approx = true} : vector<8x1xf32> -> vector<8x1xf32>
      %47 = vector.broadcast %46 : vector<8x1xf32> to vector<8x128xf32>
      %48 = arith.mulf %44, %47 : vector<8x128xf32>
      %49 = tpu.iota {dimensions = array<i32: 1>} : vector<8x128xi32>
      %c7_i32 = arith.constant 7 : i32
      %50 = vector.broadcast %c7_i32 : i32 to vector<8x128xi32>
      %51 = arith.cmpi slt, %49, %50 : vector<8x128xi32>
      %cst_32 = arith.constant -1.000000e+09 : f32
      %52 = vector.broadcast %cst_32 : f32 to vector<8x128xf32>
      %53 = arith.select %51, %48, %52 : vector<8x128xi1>, vector<8x128xf32>
      %cst_33 = arith.constant dense<0xFF800000> : vector<8xf32>
      %54 = vector.multi_reduction <maximumf>, %53, %cst_33 [1] : vector<8x128xf32> to vector<8xf32>
      %55 = vector.shape_cast %54 : vector<8xf32> to vector<8x1xf32>
      %56 = vector.broadcast %55 : vector<8x1xf32> to vector<8x128xf32>
      %57 = arith.subf %53, %56 : vector<8x128xf32>
      %58 = math.exp %57 : vector<8x128xf32>
      %cst_34 = arith.constant dense<0.000000e+00> : vector<8xf32>
      %59 = vector.multi_reduction <add>, %58, %cst_34 [1] : vector<8x128xf32> to vector<8xf32>
      %60 = vector.shape_cast %59 : vector<8xf32> to vector<8x1xf32>
      %61 = tpu.reciprocal %60 {approx = true} : vector<8x1xf32> -> vector<8x1xf32>
      %62 = vector.broadcast %61 : vector<8x1xf32> to vector<8x128xf32>
      %63 = arith.mulf %58, %62 : vector<8x128xf32>
      %c0_35 = arith.constant 0 : index
      %c0_36 = arith.constant 0 : index
      %64 = vector.load %arg6[%c0_35, %c0_36] : memref<8x128xf32, #tpu.memory_space<vmem>>, vector<8x128xf32>
      tpu.vector_store %arg6[%c0_35, %c0_36], %63 {strides = array<i32>} : memref<8x128xf32, #tpu.memory_space<vmem>>, vector<8x128xf32>,
    } else {
    }
    return
  }
  func.func @transform_0(%arg0: i32, %arg1: i32) -> (i32, i32) {
    %c0_i32 = arith.constant 0 : i32
    %c0_i32_0 = arith.constant 0 : i32
    return %arg0, %c0_i32 : i32, i32
  }
  func.func @transform_1(%arg0: i32, %arg1: i32) -> (i32, i32) {
    %c0_i32 = arith.constant 0 : i32
    %c0_i32_0 = arith.constant 0 : i32
    return %c0_i32, %arg1 : i32, i32
  }
  func.func @transform_2(%arg0: i32, %arg1: i32) -> (i32, i32) {
    %c0_i32 = arith.constant 0 : i32
    %c0_i32_0 = arith.constant 0 : i32
    return %arg1, %c0_i32 : i32, i32
  }
  func.func @transform_3(%arg0: i32, %arg1: i32) -> (i32, i32) {
    %c0_i32 = arith.constant 0 : i32
    return %arg0, %arg1 : i32, i32
  }
  func.func @transform_4(%arg0: i32, %arg1: i32) -> (i32, i32) {
    %c0_i32 = arith.constant 0 : i32
    %c0_i32_0 = arith.constant 0 : i32
    return %arg0, %c0_i32 : i32, i32
  }
}

</mosaic_0001>

<bundles_post_ra>
// kernel: gat_forward.5
= control target key start
LH: loop header
LB: loop body
LE: loop exit
PB: predicated region body
PF: predicated region fallthrough
CT: control target
= control target key end

     0   :  { %v140_v0 = vmov 0   ;;  %vm22_vm0 = vcmask 7168   ;;  %v141_v2 = vmov -inf   ;;  %vm44_vm2 = vcmask 64512   ;;  %s190_s0 = inlined_call_operand.vmem [shape: f32[8,1], index: 0, kind: input, shape index: {}]   ;;  %s191_s1 = inlined_call_operand.vmem [shape: f32[1,8], index: 1, kind: input, shape index: {}]   ;;  %s192_s3 = inlined_call_operand.vmem [shape: bf16[8,8], index: 3, kind: input, shape index: {}]   ;;  %s193_s2 = inlined_call_operand.vmem [shape: bf16[8,128], index: 2, kind: input, shape index: {}]   ;;  %s194_s4 = inlined_call_operand.vmem [shape: f32[8,128], index: 4, kind: output, shape index: {}]  }
   0x1   :  { %128 = vset.pattern.permute.xlu0 %v140_v0  ;;  %v26_v1 = vld [vmem:[%s190_s0] sm:$0xff]  ;;  %129 = vset.pattern.permute.xlu1 %v140_v0  ;;  %23 = vst.msk [vmem:[#allocation2] sm:$0xff] %vm22_vm0, %v141_v2  ;;  %v142_v12 = vmov 0.0   ;;  %vm80_vm3 = vcmask 1043456  }
   0x2   :  { %30 = vperm.xlu0 %128, %v26_v1   ;;  %130 = vset.pattern.permute.xlu2 %v140_v0  ;;  %v131_v3 = vld [vmem:[%s191_s1] ss:$0 sm:$0xff]  ;;  %24 = vst.msk [vmem:[#allocation3] sm:$0xff] %vm22_vm0, %v142_v12 }
   0x3   :  { %v40_v4 = vld [vmem:[%s192_s3] sm:$0xf] }
   0x4   :  { %v41_v7 = vunpack.c.l.bf16 %v40_v4  ;;  %v76_v19 = vld [vmem:[%s193_s2] sm:$0xf] }
   0x5   :  { %v82_v20 = vsel %vm80_vm3, %v76_v19, 0 }
   0x6   :  { %91 = vmatpush.bf16.msra.mxu0 %v82_v20 }
   0x8   :  { %v43_v13 = vld [vmem:[#allocation2] sm:$0xff] }
   0x9   :  { %v60_v27 = vld [vmem:[#allocation3] sm:$0xff] }
  0x74   :  { %v31_v5 = vpop.permute.xlu0 %30 }
  0x75   :  { %v36_v6 = vadd.f32 %v131_v3, %v31_v5 }
  0x77   :  { %vm37_vm1 = vcmp.gt.f32.partialorder %v36_v6, 0.0  ;;  %v38_v8 = vmul.f32 0.2, %v36_v6 }
  0x79   :  { %v39_v9 = vsel %vm37_vm1, %v36_v6, %v38_v8 }
  0x7a   :  { %v42_v10 = vadd.f32 %v41_v7, %v39_v9 }
  0x7c   :  { %v45_v11 = vsel %vm44_vm2, %v42_v10, -inf }
  0x7d   :  { %46 = vmax.xlane.f32.xlu0 %v45_v11 }
  0xf0   :  { %v47_v14 = vpop.xlane.xlu0 %46 }
  0xf1   :  { %v48_v15 = vmax.f32 %v43_v13, %v47_v14 }
  0xf3   :  { %v49_v16 = vsub.f32 %v43_v13, %v48_v15  ;;  %99 = vst.msk [vmem:[#allocation2] sm:$0xff] %vm22_vm0, %v48_v15  ;;  %54 = vperm.xlu1 %129, %v48_v15  }
  0xf5   :  { %v50_v17 = vmul.f32 1.442695, %v49_v16 }
  0xf7   :  { %132 = vpow2.f32 %v50_v17 }
  0xfd   :  { %v133_v18 = vpop.eup %132 }
  0xfe   :  { %71 = vperm.xlu2 %130, %v133_v18   ;;  %v61_v28 = vmul.f32 %v133_v18, %v60_v27 }
 0x158   :  { %v72_v35 = vpop.permute.xlu2 %71 }
 0x159   :  { %v74_v36 = vmul.f32 0.0, %v72_v35 }
 0x165   :  { %v55_v21 = vpop.permute.xlu1 %54 }
 0x166   :  { %v57_v22 = vsub.f32 %v42_v10, %v55_v21 }
 0x168   :  { %v58_v23 = vmul.f32 1.442695, %v57_v22 }
 0x16a   :  { %134 = vpow2.f32 %v58_v23 }
 0x170   :  { %v135_v24 = vpop.eup %134 }
 0x171   :  { %v62_v25 = vsel %vm44_vm2, %v135_v24, 0.0  ;;  %v75_v26 = vpack.c.bf16 %v135_v24, %v135_v24 }
 0x172   :  { %63 = vadd.xlane.f32.xlu1 %v62_v25 }
 0x173   :  { %123 = vmatmul.msk.bf16.vlgmr.msra.gmra.mxu0 %vm44_vm2, %v75_v26 }
 0x1e5   :  { %v64_v29 = vpop.xlane.xlu1 %63 }
 0x1e6   :  { %v65_v30 = vadd.f32 %v64_v29, %v61_v28 }
 0x1e8   :  { %67 = vst.msk [vmem:[#allocation3] sm:$0xff] %vm22_vm0, %v65_v30 }
 0x1ef   :  { %v104_v31 = vld [vmem:[#allocation3] sm:$0xff] }
 0x1f0   :  { %v93_v32 = vpop.f32.mrf.mxu0  ;;  %136 = vrcp.f32 %v104_v31 }
 0x1f1   :  { %v97_v37 = vadd.f32 %v93_v32, %v74_v36 }
 0x1f6   :  { %v137_v33 = vpop.eup %136 }
 0x1f7   :  { %108 = vperm.xlu2 %130, %v137_v33  }
 0x1f8   :  { %v95_v34 = vpop.f32.mrf.mxu0 }
 0x251   :  { %v109_v38 = vpop.permute.xlu2 %108 }
 0x252   :  { %v111_v39 = vmul.f32 %v109_v38, %v97_v37 }
 0x254   :  { %v113_v40 = vmin.f32 %v111_v39, 0.0  ;;  %vm112_vm4 = vcmp.gt.f32.partialorder %v111_v39, 0.0 }
 0x256   :  { %v114_v41 = vmul.f32 1.442695, %v113_v40 }
 0x258   :  { %138 = vpow2.f32 %v114_v41 }
 0x25e   :  { %v139_v42 = vpop.eup %138 }
 0x25f   :  { %v124_v43 = vadd.f32 -1.0, %v139_v42 }
 0x261   :  { %v117_v44 = vsel %vm112_vm4, %v111_v39, %v124_v43 }
 0x262   :  { %118 = vst [vmem:[%s194_s4] sm:$0xff] %v117_v44 }

// kernel: gat_forward.6
= control target key start
LH: loop header
LB: loop body
LE: loop exit
PB: predicated region body
PF: predicated region fallthrough
CT: control target
= control target key end

     0   :  { %vm35_vm0 = vcmask 261120   ;;  %vm60_vm1 = vcmask 7168   ;;  %s146_s1 = inlined_call_operand.vmem [shape: bf16[32,128], index: 1, kind: input, shape index: {}]   ;;  %s147_s0 = inlined_call_operand.vmem [shape: bf16[8,32], index: 0, kind: input, shape index: {}]   ;;  %s148_s2 = inlined_call_operand.vmem [shape: f32[2,128], index: 2, kind: input, shape index: {}]   ;;  %s149_s3 = inlined_call_operand.vmem [shape: bf16[8,128], index: 3, kind: output, shape index: {0}]   ;;  %s150_s4 = inlined_call_operand.vmem [shape: f32[8,1], index: 4, kind: output, shape index: {1}]   ;;  %s151_s5 = inlined_call_operand.vmem [shape: f32[8,1], index: 5, kind: output, shape index: {2}]  }
   0x1   :  { %v89_v0 = vld [vmem:[%s146_s1 + $0x8] sm:$0xff]  ;;  %v88_v1 = vld [vmem:[%s146_s1] sm:$0xff] }
   0x2   :  { %45 = vmatpush.bf16.msra.mxu0 %v89_v0  ;;  %v18_v2 = vld [vmem:[%s147_s0] sm:$0xf] }
   0x3   :  { %v90_v3 = vld [vmem:[%s148_s2] ss:$0 sm:$0xff]  ;;  %v91_v7 = vld [vmem:[%s148_s2 + $0x1] ss:$0 sm:$0xff] }
   0x6   :  { %46 = vmatpush.bf16.msra.mxu0 %v88_v1 }
   0x9   :  { %87 = vmatmul.msk.bf16.vlgmr.msra.gmra.mxu0 %vm35_vm0, %v18_v2 }
  0x86   :  { %v48_v4 = vpop.f32.mrf.mxu0 }
  0x87   :  { %v52_v5 = vpack.c.bf16 %v48_v4, %v48_v4  ;;  %v57_v6 = vmul.f32 %v90_v3, %v48_v4  ;;  %v63_v9 = vmul.f32 %v91_v7, %v48_v4 }
  0x89   :  { %53 = vst [vmem:[%s149_s3] sm:$0xf] %v52_v5  ;;  %58 = vadd.xlane.f32.xlu0 %v57_v6 }
  0x8e   :  { %v50_v8 = vpop.f32.mrf.mxu0 }
  0x91   :  { %64 = vadd.xlane.f32.xlu0 %v63_v9 }
  0xfc   :  { %v59_v10 = vpop.xlane.xlu0 %58 }
  0xfd   :  { %61 = vst.msk [vmem:[%s150_s4] sm:$0xff] %vm60_vm1, %v59_v10 }
 0x104   :  { %v65_v11 = vpop.xlane.xlu0 %64 }
 0x105   :  { %66 = vst.msk [vmem:[%s151_s5] sm:$0xff] %vm60_vm1, %v65_v11 }

// kernel: gat_forward.4
= control target key start
LH: loop header
LB: loop body
LE: loop exit
PB: predicated region body
PF: predicated region fallthrough
CT: control target
= control target key end

     0   :  { %vm27_vm0 = vcmask 130048   ;;  %vm52_vm1 = vcmask 7168   ;;  %s130_s1 = inlined_call_operand.vmem [shape: bf16[16,128], index: 1, kind: input, shape index: {}]   ;;  %s131_s0 = inlined_call_operand.vmem [shape: bf16[8,16], index: 0, kind: input, shape index: {}]   ;;  %s132_s2 = inlined_call_operand.vmem [shape: f32[2,128], index: 2, kind: input, shape index: {}]   ;;  %s133_s3 = inlined_call_operand.vmem [shape: bf16[8,128], index: 3, kind: output, shape index: {0}]   ;;  %s134_s4 = inlined_call_operand.vmem [shape: f32[8,1], index: 4, kind: output, shape index: {1}]   ;;  %s135_s5 = inlined_call_operand.vmem [shape: f32[8,1], index: 5, kind: output, shape index: {2}]  }
   0x1   :  { %v76_v0 = vld [vmem:[%s130_s1] sm:$0xff] }
   0x2   :  { %38 = vmatpush.bf16.msra.mxu0 %v76_v0  ;;  %v18_v1 = vld [vmem:[%s131_s0] sm:$0xf] }
   0x3   :  { %v77_v2 = vld [vmem:[%s132_s2] ss:$0 sm:$0xff]  ;;  %v78_v6 = vld [vmem:[%s132_s2 + $0x1] ss:$0 sm:$0xff] }
   0x5   :  { %75 = vmatmul.msk.bf16.vlgmr.msra.gmra.mxu0 %vm27_vm0, %v18_v1 }
  0x82   :  { %v40_v3 = vpop.f32.mrf.mxu0 }
  0x83   :  { %v44_v4 = vpack.c.bf16 %v40_v3, %v40_v3  ;;  %v49_v5 = vmul.f32 %v77_v2, %v40_v3  ;;  %v55_v8 = vmul.f32 %v78_v6, %v40_v3 }
  0x85   :  { %45 = vst [vmem:[%s133_s3] sm:$0xf] %v44_v4  ;;  %50 = vadd.xlane.f32.xlu0 %v49_v5 }
  0x8a   :  { %v42_v7 = vpop.f32.mrf.mxu0 }
  0x8d   :  { %56 = vadd.xlane.f32.xlu0 %v55_v8 }
  0xf8   :  { %v51_v9 = vpop.xlane.xlu0 %50 }
  0xf9   :  { %53 = vst.msk [vmem:[%s134_s4] sm:$0xff] %vm52_vm1, %v51_v9 }
 0x100   :  { %v57_v10 = vpop.xlane.xlu0 %56 }
 0x101   :  { %58 = vst.msk [vmem:[%s135_s5] sm:$0xff] %vm52_vm1, %v57_v10 }

// kernel: gat_forward.7
= control target key start
LH: loop header
LB: loop body
LE: loop exit
PB: predicated region body
PF: predicated region fallthrough
CT: control target
= control target key end

     0   :  { %v188_v1 = vmov 0   ;;  %s239_s0 = inlined_call_operand.vmem [shape: f32[8,1], index: 0, kind: input, shape index: {}]   ;;  %s240_s1 = inlined_call_operand.vmem [shape: f32[1,8], index: 1, kind: input, shape index: {}]   ;;  %s241_s2 = inlined_call_operand.vmem [shape: bf16[8,128], index: 2, kind: input, shape index: {}]   ;;  %s242_s3 = inlined_call_operand.vmem [shape: bf16[8,8], index: 3, kind: input, shape index: {}]   ;;  %s243_s4 = inlined_call_operand.hbm [shape: f32[8,128], index: 4, kind: output, shape index: {}]  }
   0x1   :  { %v27_v0 = vld [vmem:[%s239_s0] sm:$0xff]  ;;  %148 = vset.pattern.permute.xlu0 %v188_v1  ;;  %149 = vset.pattern.permute.xlu1 %v188_v1 }
   0x2   :  { %9 = vsyncpa [#allocation6], 0  ;;  %31 = vperm.xlu0 %148, %v27_v0   ;;  %150 = vset.pattern.permute.xlu2 %v188_v1  ;;  %v151_v2 = vld [vmem:[%s240_s1] ss:$0 sm:$0xff]  ;;  %vm45_vm1 = vcmask 64512   ;;  %vm23_vm2 = vcmask 7168   ;;  %v113_v36 = vlaneseq }
   0x3   :  { %v41_v3 = vld [vmem:[%s242_s3] sm:$0xf]  ;;  %v189_v11 = vmov -inf   ;;  %v190_v12 = vmov 0.0   ;;  %vm81_vm3 = vcmask 1043456   ;;  %s134_s23 = sshll.u32 %s243_s4, 4  ;;  %s135_s23 = int_to_ptr.hbm [resolvable:$true] %s134_s23 }
   0x4   :  { %v42_v6 = vunpack.c.l.bf16 %v41_v3  ;;  %24 = vst.msk [vmem:[#allocation2] sm:$0xff] %vm23_vm2, %v189_v11  ;;  %v77_v19 = vld [vmem:[%s241_s2] sm:$0xf]  ;;  %v114_v37 = vand.u32 127, %v113_v36  ;;  %s191_s2 = smov [#allocation5]  }
   0x5   :  { %25 = vst.msk [vmem:[#allocation3] sm:$0xff] %vm23_vm2, %v190_v12  ;;  %v83_v20 = vsel %vm81_vm3, %v77_v19, 0  ;;  %s132_s3 = sshll.u32 %s191_s2, 4  ;;  %s133_s3 = int_to_ptr.vmem [resolvable:$true] %s132_s3 }
   0x6   :  { %92 = vmatpush.bf16.msra.mxu0 %v83_v20  ;;  %vm115_vm4 = vcmp.lt.s32.totalorder %v114_v37, 7 }
   0xb   :  { %v44_v13 = vld [vmem:[#allocation2] sm:$0xff] }
   0xc   :  { %v61_v27 = vld [vmem:[#allocation3] sm:$0xff] }
  0x74   :  { %v32_v4 = vpop.permute.xlu0 %31 }
  0x75   :  { %v37_v5 = vadd.f32 %v151_v2, %v32_v4 }
  0x77   :  { %vm38_vm0 = vcmp.gt.f32.partialorder %v37_v5, 0.0  ;;  %v39_v7 = vmul.f32 0.2, %v37_v5 }
  0x79   :  { %v40_v8 = vsel %vm38_vm0, %v37_v5, %v39_v7 }
  0x7a   :  { %v43_v9 = vadd.f32 %v42_v6, %v40_v8 }
  0x7c   :  { %v46_v10 = vsel %vm45_vm1, %v43_v9, -inf }
  0x7d   :  { %47 = vmax.xlane.f32.xlu0 %v46_v10 }
  0xf0   :  { %v48_v14 = vpop.xlane.xlu0 %47 }
  0xf1   :  { %v49_v15 = vmax.f32 %v44_v13, %v48_v14 }
  0xf3   :  { %v50_v16 = vsub.f32 %v44_v13, %v49_v15  ;;  %100 = vst.msk [vmem:[#allocation2] sm:$0xff] %vm23_vm2, %v49_v15  ;;  %55 = vperm.xlu1 %149, %v49_v15  }
  0xf5   :  { %v51_v17 = vmul.f32 1.442695, %v50_v16 }
  0xf7   :  { %152 = vpow2.f32 %v51_v17 }
  0xfd   :  { %v153_v18 = vpop.eup %152 }
  0xfe   :  { %72 = vperm.xlu2 %150, %v153_v18   ;;  %v62_v28 = vmul.f32 %v153_v18, %v61_v27 }
 0x158   :  { %v73_v35 = vpop.permute.xlu2 %72 }
 0x159   :  { %v75_v38 = vmul.f32 0.0, %v73_v35 }
 0x165   :  { %v56_v21 = vpop.permute.xlu1 %55 }
 0x166   :  { %v58_v22 = vsub.f32 %v43_v9, %v56_v21 }
 0x168   :  { %v59_v23 = vmul.f32 1.442695, %v58_v22 }
 0x16a   :  { %154 = vpow2.f32 %v59_v23 }
 0x170   :  { %v155_v24 = vpop.eup %154 }
 0x171   :  { %v63_v25 = vsel %vm45_vm1, %v155_v24, 0.0  ;;  %v76_v26 = vpack.c.bf16 %v155_v24, %v155_v24 }
 0x172   :  { %64 = vadd.xlane.f32.xlu1 %v63_v25 }
 0x173   :  { %143 = vmatmul.msk.bf16.vlgmr.msra.gmra.mxu0 %vm45_vm1, %v76_v26 }
 0x1e5   :  { %v65_v29 = vpop.xlane.xlu1 %64 }
 0x1e6   :  { %v66_v30 = vadd.f32 %v65_v29, %v62_v28 }
 0x1e8   :  { %68 = vst.msk [vmem:[#allocation3] sm:$0xff] %vm23_vm2, %v66_v30 }
 0x1ef   :  { %v105_v31 = vld [vmem:[#allocation3] sm:$0xff] }
 0x1f0   :  { %v94_v32 = vpop.f32.mrf.mxu0  ;;  %156 = vrcp.f32 %v105_v31 }
 0x1f1   :  { %v98_v39 = vadd.f32 %v94_v32, %v75_v38 }
 0x1f6   :  { %v157_v33 = vpop.eup %156 }
 0x1f7   :  { %109 = vperm.xlu2 %150, %v157_v33  }
 0x1f8   :  { %v96_v34 = vpop.f32.mrf.mxu0 }
 0x251   :  { %v110_v40 = vpop.permute.xlu2 %109 }
 0x252   :  { %v112_v41 = vmul.f32 %v110_v40, %v98_v39 }
 0x254   :  { %v116_v42 = vsel %vm115_vm4, %v112_v41, -1e+09 }
 0x255   :  { %117 = vmax.xlane.f32.xlu2 %v116_v42 }
 0x2c8   :  { %v118_v43 = vpop.xlane.xlu2 %117 }
 0x2c9   :  { %v119_v44 = vsub.f32 %v116_v42, %v118_v43 }
 0x2cb   :  { %v120_v45 = vmul.f32 1.442695, %v119_v44 }
 0x2cd   :  { %158 = vpow2.f32 %v120_v45 }
 0x2d3   :  { %v159_v46 = vpop.eup %158 }
 0x2d4   :  { %122 = vadd.xlane.f32.xlu0 %v159_v46 }
 0x347   :  { %v123_v47 = vpop.xlane.xlu0 %122 }
 0x348   :  { %160 = vrcp.f32 %v123_v47 }
 0x34e   :  { %v161_v48 = vpop.eup %160 }
 0x34f   :  { %v125_v49 = vmul.f32 %v161_v48, %v159_v46 }
 0x351   :  { %126 = vst [vmem:[#allocation5] sm:$0xff] %v125_v49 }
 0x352   :  { %137 = dma.vmem_to_hbm [thread:$0]  %s133_s3, 128, %s135_s23, [#allocation6]  }
 0x353   :  { %186 = dma.done.wait [#allocation6], 128  }
 0x354   :  { %187 = vsyncadd [#allocation6], 4294967168 }
 0x355   :  { %142 = vsyncpa [#allocation6], 1 }

</bundles_post_ra>
